<compile_context>
chip_gen: v5e
topology: v5e:2x2
jax: 0.10.0
libtpu: 0.0.40
codegen_flags: <defaults>
</compile_context>

<pallas_src>
import math

import jax
import jax.numpy as jnp
from jax.experimental import pallas as pl
from jax.experimental.pallas import tpu as pltpu


def _sinusoidal_kernel_factory(dim):
    half_dim = dim // 2
    neg_scale = -(math.log(10000.0) / (half_dim - 1))

    def kernel(x_ref, out_ref):
        # x_ref:   (TB, 1)   timesteps (batch rows -> sublanes)
        # out_ref: (TB, dim) [sin(x*1000*f) | cos(x*1000*f)]
        # Frequency row built on the fly; the original *1000 scale is folded in.
        i = jax.lax.broadcasted_iota(jnp.int32, (1, half_dim), 1).astype(jnp.float32)
        freqs = jnp.exp(i * neg_scale) * 1000.0          # (1, half_dim), EUP exp
        emb = x_ref[...] * freqs                         # (TB, half_dim) VPU broadcast-mul
        out_ref[:, :half_dim] = jnp.sin(emb)             # direct slice stores —
        out_ref[:, half_dim:] = jnp.cos(emb)             # no lane concatenate

    return kernel


def sinusoidal_pos_emb(x, dim, *, block_rows=1024):
    """JAX/Pallas equivalent of SinusoidalPosEmb(dim)(x) -> (B, dim) float32."""
    assert dim % 2 == 0 and dim >= 4, "dim must be even and >= 4 (half_dim-1 > 0)"
    shape = jnp.shape(x)
    # PyTorch does x.squeeze() then asserts 1-D; reshape(-1) is equivalent but
    # also survives B == 1 (where squeeze would collapse to a 0-D scalar).
    assert sum(d > 1 for d in shape) <= 1, "input must squeeze to a 1-D vector"
    x1d = jnp.asarray(x, dtype=jnp.float32).reshape(-1)
    b = x1d.shape[0]

    if b <= block_rows:
        tb = b                       # single full-array block (no (8,128) issue)
    else:
        tb = block_rows              # gridded path: must be a sublane multiple
        assert tb % 8 == 0
    grid = (pl.cdiv(b, tb),)

    out = pl.pallas_call(
        _sinusoidal_kernel_factory(dim),
        out_shape=jax.ShapeDtypeStruct((b, dim), jnp.float32),
        grid=grid,
        in_specs=[pl.BlockSpec((tb, 1), lambda i: (i, 0))],
        out_specs=pl.BlockSpec((tb, dim), lambda i: (i, 0)),
        compiler_params=pltpu.CompilerParams(
            dimension_semantics=("parallel",),   # lets v7x shard batch over 2 TCs
        ),
    )(x1d.reshape(b, 1))
    return out


def sinusoidal_pos_emb_ref(x, dim):
    """Pure-JAX reference matching the PyTorch forward (same op order)."""
    x = jnp.asarray(x, dtype=jnp.float32).reshape(-1) * 1000.0
    half_dim = dim // 2
    emb = math.log(10000.0) / (half_dim - 1)
    emb = jnp.exp(jnp.arange(half_dim, dtype=jnp.float32) * -emb)
    emb = x[:, None] * emb[None, :]
    return jnp.concatenate([jnp.sin(emb), jnp.cos(emb)], axis=-1)


if __name__ == "__main__":
    key = jax.random.PRNGKey(0)
    B, DIM = 8, 32
    # Timesteps in [0, 1), shaped (B, 1) so the squeeze semantics are exercised.
    x = jax.random.uniform(key, (B, 1), dtype=jnp.float32)

    out = jax.block_until_ready(sinusoidal_pos_emb(x, DIM))
    ref = sinusoidal_pos_emb_ref(x, DIM)
    assert out.shape == (B, DIM), out.shape
    # atol accounts for f32 reassociation of the folded *1000 scale: sin/cos
    # arguments reach ~1e3, so ~1-2 ULP of argument drift is ~1e-4 in output.
    assert jnp.allclose(out, ref, atol=5e-4, rtol=1e-5), "mismatch vs reference (B=8)"

    # Exercise the gridded / multi-tile path (3 tiles of 64 rows, parallel axis).
    B2 = 192
    x2 = jax.random.uniform(jax.random.PRNGKey(1), (B2,), dtype=jnp.float32)
    out2 = jax.block_until_ready(sinusoidal_pos_emb(x2, DIM, block_rows=64))
    ref2 = sinusoidal_pos_emb_ref(x2, DIM)
    assert out2.shape == (B2, DIM), out2.shape
    assert jnp.allclose(out2, ref2, atol=5e-4, rtol=1e-5), "mismatch vs reference (B=192)"

    print("KERNEL_OK")
</pallas_src>

<mosaic_0001>
module attributes {stable_mosaic.version = 11 : i64} {
  func.func @kernel(%arg0: i32, %arg1: memref<8x1xf32, #tpu.memory_space<vmem>>, %arg2: memref<8x32xf32, #tpu.memory_space<vmem>>) attributes {dimension_semantics = [#tpu.dimension_semantics<parallel>], iteration_bounds = array<i64: 1>, scalar_prefetch = 0 : i64, scratch_operands = 0 : i64, tpu.core_type = #tpu.core_type<tc>, window_params = [{transform_indices = @transform_0, window_bounds = array<i64: 8, 1>}, {transform_indices = @transform_1, window_bounds = array<i64: 8, 32>}]} {
    %0 = tpu.iota {dimensions = array<i32: 1>} : vector<1x16xi32>
    %1 = arith.sitofp %0 : vector<1x16xi32> to vector<1x16xf32>
    %cst = arith.constant -0.614022672 : f32
    %2 = vector.broadcast %cst : f32 to vector<1x16xf32>
    %3 = arith.mulf %1, %2 : vector<1x16xf32>
    %4 = math.exp %3 : vector<1x16xf32>
    %cst_0 = arith.constant 1.000000e+03 : f32
    %5 = vector.broadcast %cst_0 : f32 to vector<1x16xf32>
    %6 = arith.mulf %4, %5 : vector<1x16xf32>
    %c0 = arith.constant 0 : index
    %c0_1 = arith.constant 0 : index
    %7 = vector.load %arg1[%c0, %c0_1] : memref<8x1xf32, #tpu.memory_space<vmem>>, vector<8x1xf32>
    %8 = vector.broadcast %7 : vector<8x1xf32> to vector<8x16xf32>
    %9 = vector.broadcast %6 : vector<1x16xf32> to vector<8x16xf32>
    %10 = arith.mulf %8, %9 : vector<8x16xf32>
    %11 = math.sin %10 : vector<8x16xf32>
    %c0_2 = arith.constant 0 : index
    %c0_3 = arith.constant 0 : index
    %12 = vector.load %arg2[%c0_2, %c0_3] : memref<8x32xf32, #tpu.memory_space<vmem>>, vector<8x16xf32>
    tpu.vector_store %arg2[%c0_2, %c0_3], %11 {strides = array<i32>} : memref<8x32xf32, #tpu.memory_space<vmem>>, vector<8x16xf32>,
    %13 = math.cos %10 : vector<8x16xf32>
    %c0_4 = arith.constant 0 : index
    %c16 = arith.constant 16 : index
    %14 = vector.load %arg2[%c0_4, %c16] : memref<8x32xf32, #tpu.memory_space<vmem>>, vector<8x16xf32>
    tpu.vector_store %arg2[%c0_4, %c16], %13 {strides = array<i32>} : memref<8x32xf32, #tpu.memory_space<vmem>>, vector<8x16xf32>,
    return
  }
  func.func @transform_0(%arg0: i32) -> (i32, i32) {
    %c0_i32 = arith.constant 0 : i32
    %c0_i32_0 = arith.constant 0 : i32
    return %arg0, %c0_i32 : i32, i32
  }
  func.func @transform_1(%arg0: i32) -> (i32, i32) {
    %c0_i32 = arith.constant 0 : i32
    %c0_i32_0 = arith.constant 0 : i32
    return %arg0, %c0_i32 : i32, i32
  }
}

</mosaic_0001>

<bundles_post_ra>
// kernel: tpu_custom_call.1
= control target key start
LH: loop header
LB: loop body
LE: loop exit
PB: predicated region body
PF: predicated region fallthrough
CT: control target
= control target key end

     0   :  { %v400_v1 = vmov 0   ;;  %s476_s0 = inlined_call_operand.vmem [shape: f32[8,1], index: 0, kind: input, shape index: {}]   ;;  %s477_s1 = inlined_call_operand.hbm [shape: f32[8,32], index: 1, kind: output, shape index: {}]  }
   0x1   :  { %v16_v0 = vld [vmem:[%s476_s0] sm:$0xff]  ;;  %371 = vset.pattern.permute.xlu0 %v400_v1 }
   0x2   :  { %19 = vperm.xlu0 %371, %v16_v0  }
   0x3   :  { %6 = vsyncpa [#allocation3], 0  ;;  %v9_v2 = vlaneseq  ;;  %v401_v22 = vmov 683565275   ;;  %v402_v24 = vmov 2475754826  }
   0x4   :  { %v403_v26 = vmov 2131351028   ;;  %v404_v28 = vmov 2102212464   ;;  %v405_v33 = vmov 920167782  }
   0x5   :  { %v10_v3 = vand.u32 127, %v9_v2  ;;  %v406_v36 = vmov 1326507024   ;;  %s407_s0 = smov 16   ;;  %s408_s8 = smov [#allocation2]  }
   0x6   :  { %s345_s9 = sshll.u32 %s408_s8, 4  ;;  %s347_s12 = sshll.u32 %s477_s1, 4  ;;  %s346_s9 = int_to_ptr.vmem [resolvable:$true] %s345_s9  ;;  %s348_s12 = int_to_ptr.hbm [resolvable:$true] %s347_s12 }
   0x7   :  { %v11_v4 = vcvt.s32.f32 %v10_v3 }
   0x9   :  { %v12_v5 = vmul.f32 -0.6140227, %v11_v4 }
   0xb   :  { %v13_v6 = vmul.f32 1.442695, %v12_v5 }
   0xd   :  { %372 = vpow2.f32 %v13_v6 }
  0x13   :  { %v373_v7 = vpop.eup %372 }
  0x14   :  { %v15_v8 = vmul.f32 1000.0, %v373_v7 }
  0x74   :  { %v20_v9 = vpop.permute.xlu0 %19 }
  0x75   :  { %v423_v10 = vmul.f32 %v20_v9, %v15_v8 }
  0x77   :  { %v26_v11 = vand.u32 2139095040, %v423_v10  ;;  %v23_v13 = vand.u32 2147483647, %v423_v10  ;;  %vm25_vm12 = vcmp.lt.s32.totalorder %v423_v10, 0 }
  0x79   :  { %v27_v12 = vshrl.u32 %v26_v11, 23  ;;  %v30_v16 = vand.u32 8388607, %v23_v13  ;;  %vm24_vm13 = vcmp.le.f32.partialorder %v23_v13, 0.7853982 }
  0x7b   :  { %v356_v14 = vadd.s32 4294967169, %v27_v12  ;;  %v31_v19 = vor.u32 8388608, %v30_v16 }
  0x7d   :  { %v33_v15 = vadd.s32 1, %v356_v14  ;;  %v431_v38 = vshll.u32 %v31_v19, 8 }
  0x7f   :  { %vm34_vm0 = vcmp.gt.s32.totalorder %v33_v15, 0  ;;  %v72_v50 = vand.u32 65535, %v431_v38  ;;  %v73_v52 = vshrl.u32 %v431_v38, 16 }
  0x80   :  { %v35_v17 = vsel %vm34_vm0, %v33_v15, 0 }
  0x81   :  { %v37_v18 = vand.u32 31, %v35_v17  ;;  %v429_v20 = vshrl.u32 %v35_v17, 5 }
  0x83   :  { %v38_v21 = vsub.s32 32, %v37_v18  ;;  %v40_v23 = vshll.u32 %v401_v22, %v37_v18  ;;  %v43_v25 = vshll.u32 %v402_v24, %v37_v18  ;;  %v46_v27 = vshll.u32 %v403_v26, %v37_v18 }
  0x84   :  { %v49_v29 = vshll.u32 %v404_v28, %v37_v18  ;;  %v52_v35 = vshll.u32 %v405_v33, %v37_v18  ;;  %vm55_vm1 = vcmp.lt.s32.totalorder %v429_v20, 1  ;;  %vm58_vm2 = vcmp.lt.s32.totalorder %v429_v20, 4 }
  0x85   :  { %v41_v30 = vshrl.u32 %v402_v24, %v38_v21  ;;  %v44_v31 = vshrl.u32 %v403_v26, %v38_v21  ;;  %v47_v32 = vshrl.u32 %v404_v28, %v38_v21  ;;  %v50_v34 = vshrl.u32 %v405_v33, %v38_v21 }
  0x86   :  { %v53_v37 = vshrl.u32 %v406_v36, %v38_v21  ;;  %vm57_vm3 = vcmp.lt.s32.totalorder %v429_v20, 3  ;;  %vm56_vm4 = vcmp.lt.s32.totalorder %v429_v20, 2  ;;  %v39_v15 = vshrl.u32 %v401_v22, %v38_v21 }
  0x87   :  { %v42_v39 = vor.u32 %v41_v30, %v40_v23  ;;  %v45_v40 = vor.u32 %v44_v31, %v43_v25  ;;  %v48_v41 = vor.u32 %v47_v32, %v46_v27  ;;  %v51_v42 = vor.u32 %v50_v34, %v49_v29 }
  0x88   :  { %v54_v43 = vor.u32 %v53_v37, %v52_v35 }
  0x89   :  { %v63_v44 = vsel %vm55_vm1, %v42_v39, %v45_v40  ;;  %v64_v45 = vsel %vm58_vm2, %v51_v42, 920167782  ;;  %v67_v46 = vsel %vm55_vm1, %v45_v40, %v48_v41  ;;  %v60_v11 = vsel %vm58_vm2, %v48_v41, 2102212464 }
  0x8a   :  { %v65_v47 = vsel %vm57_vm3, %v48_v41, %v64_v45  ;;  %v68_v48 = vsel %vm58_vm2, %v54_v43, 1326507024  ;;  %v59_v24 = vsel %vm55_vm1, %v39_v15, %v42_v39  ;;  %v61_v25 = vsel %vm57_vm3, %v45_v40, %v60_v11 }
  0x8b   :  { %v69_v49 = vsel %vm57_vm3, %v51_v42, %v68_v48  ;;  %v66_v51 = vsel %vm56_vm4, %v63_v44, %v65_v47  ;;  %v62_v22 = vsel %vm56_vm4, %v59_v24, %v61_v25 }
  0x8c   :  { %v70_v53 = vsel %vm56_vm4, %v67_v46, %v69_v49  ;;  %v96_v54 = vand.u32 65535, %v66_v51  ;;  %v97_v55 = vshrl.u32 %v66_v51, 16  ;;  %v116_v34 = vmul.u32 %v431_v38, %v62_v22 }
  0x8d   :  { %v74_v56 = vand.u32 65535, %v70_v53  ;;  %v75_v57 = vshrl.u32 %v70_v53, 16  ;;  %vm178_vm4 = vcmask 130048  }
  0x8e   :  { %v99_v58 = vmul.u32 %v97_v55, %v72_v50  ;;  %v100_v59 = vmul.u32 %v96_v54, %v73_v52  ;;  %v98_v62 = vmul.u32 %v96_v54, %v72_v50  ;;  %v101_v3 = vmul.u32 %v97_v55, %v73_v52 }
  0x8f   :  { %v77_v60 = vmul.u32 %v75_v57, %v72_v50  ;;  %v78_v61 = vmul.u32 %v74_v56, %v73_v52  ;;  %v76_v0 = vmul.u32 %v74_v56, %v72_v50  ;;  %v79_v4 = vmul.u32 %v75_v57, %v73_v52 }
  0x90   :  { %v102_v63 = vshll.u32 %v99_v58, 16  ;;  %v104_v5 = vshll.u32 %v100_v59, 16  ;;  %v103_v19 = vshrl.u32 %v99_v58, 16  ;;  %v105_v28 = vshrl.u32 %v100_v59, 16 }
  0x91   :  { %v80_v2 = vshll.u32 %v77_v60, 16  ;;  %v82_v7 = vshll.u32 %v78_v61, 16  ;;  %v81_v26 = vshrl.u32 %v77_v60, 16  ;;  %v83_v30 = vshrl.u32 %v78_v61, 16 }
  0x92   :  { %vm106_vm5 = vc.u32 %v98_v62, %v102_v63  ;;  %v108_v6 = vadd.s32 %v102_v63, %v98_v62 }
  0x93   :  { %vm84_vm6 = vc.u32 %v76_v0, %v80_v2  ;;  %v86_v8 = vadd.s32 %v80_v2, %v76_v0  ;;  %v107_v9 = vsel %vm106_vm5, 1, %v400_v1  ;;  %vm166_vm5 = vweird.f32 %v423_v10 }
  0x94   :  { %v85_v12 = vsel %vm84_vm6, 1, %v400_v1  ;;  %v109_v14 = vadd.s32 %v107_v9, %v101_v3  ;;  %vm110_vm7 = vc.u32 %v108_v6, %v104_v5  ;;  %vm338_vm6 = vcmask 261248  }
  0x95   :  { %v87_v16 = vadd.s32 %v85_v12, %v79_v4  ;;  %vm88_vm8 = vc.u32 %v86_v8, %v82_v7  ;;  %v111_v17 = vsel %vm110_vm7, 1, %v400_v1 }
  0x96   :  { %v89_v18 = vsel %vm88_vm8, 1, %v400_v1  ;;  %v113_v23 = vadd.s32 %v111_v17, %v109_v14  ;;  %v112_v1 = vadd.s32 %v108_v6, %v104_v5 }
  0x97   :  { %v91_v27 = vadd.s32 %v89_v18, %v87_v16 }
  0x98   :  { %v114_v29 = vadd.s32 %v113_v23, %v103_v19 }
  0x99   :  { %v92_v21 = vadd.s32 %v91_v27, %v81_v26 }
  0x9a   :  { %v115_v31 = vadd.s32 %v114_v29, %v105_v28 }
  0x9b   :  { %v93_v32 = vadd.s32 %v92_v21, %v83_v30 }
  0x9c   :  { %v119_v33 = vadd.s32 1, %v115_v31 }
  0x9d   :  { %vm118_vm9 = vc.u32 %v93_v32, %v112_v1  ;;  %v117_v46 = vadd.s32 %v112_v1, %v93_v32 }
  0x9e   :  { %v120_v35 = vsel %vm118_vm9, %v119_v33, %v115_v31 }
  0x9f   :  { %v121_v36 = vadd.s32 %v120_v35, %v116_v34 }
  0xa1   :  { %v122_v37 = vadd.s32 536870912, %v121_v36 }
  0xa3   :  { %v123_v39 = vshrl.u32 %v122_v37, 30 }
  0xa5   :  { %v124_v40 = vshll.u32 %v123_v39, 30  ;;  %v147_v59 = vsub.s32 4, %v123_v39 }
  0xa7   :  { %v125_v41 = vsub.s32 %v121_v36, %v124_v40  ;;  %v148_v0 = vsel %vm25_vm12, %v147_v59, %v123_v39 }
  0xa8   :  { %v150_v4 = vsel %vm24_vm13, 0, %v148_v0 }
  0xa9   :  { %vm126_vm10 = vcmp.lt.s32.totalorder %v125_v41, 0  ;;  %v127_v42 = vsub.s32 0, %v125_v41  ;;  %v167_v9 = vadd.s32 3, %v150_v4  ;;  %v324_v15 = vand.u32 3, %v150_v4 }
  0xab   :  { %v128_v43 = vsel %vm126_vm10, %v127_v42, %v125_v41  ;;  %v168_v16 = vand.u32 3, %v167_v9  ;;  %vm325_vm14 = vcmp.lt.s32.totalorder %v324_v15, 2  ;;  %vm326_vm15 = vcmp.eq.s32.totalorder %v324_v15, 0 }
  0xac   :  { %v129_v44 = vclz %v128_v43  ;;  %vm329_vm0 = vcmp.eq.s32.totalorder %v324_v15, 2 }
  0xad   :  { %vm169_vm1 = vcmp.lt.s32.totalorder %v168_v16, 2  ;;  %vm170_vm2 = vcmp.eq.s32.totalorder %v168_v16, 0  ;;  %vm173_vm3 = vcmp.eq.s32.totalorder %v168_v16, 2 }
  0xae   :  { %v357_v45 = vadd.s32 4294967294, %v129_v44 }
  0xb0   :  { %vm358_vm11 = vcmp.lt.s32.totalorder %v357_v45, 0 }
  0xb1   :  { %v132_v20 = vsel %vm358_vm11, 0, %v357_v45 }
  0xb2   :  { %v133_v47 = vsub.s32 32, %v132_v20  ;;  %v137_v48 = vsub.s32 4294967266, %v132_v20  ;;  %v134_v49 = vshll.u32 %v125_v41, %v132_v20 }
  0xb4   :  { %v135_v50 = vshrl.u32 %v117_v46, %v133_v47  ;;  %v138_v38 = vadd.s32 127, %v137_v48 }
  0xb6   :  { %v136_v51 = vor.u32 %v135_v50, %v134_v49  ;;  %v139_v52 = vshll.u32 %v138_v38, 23 }
  0xb8   :  { %v140_v53 = vor.u32 4788187, %v139_v52  ;;  %v143_v55 = vcvt.s32.f32 %v136_v51 }
  0xba   :  { %v141_v54 = vand.u32 2147483647, %v140_v53 }
  0xbc   :  { %v144_v56 = vmul.f32 %v143_v55, %v141_v54 }
  0xbe   :  { %v145_v57 = vxor.u32 2147483648, %v144_v56 }
  0xc0   :  { %v146_v58 = vsel %vm25_vm12, %v145_v57, %v144_v56 }
  0xc1   :  { %v149_v60 = vsel %vm24_vm13, %v423_v10, %v146_v58 }
  0xc2   :  { %v151_v61 = vmul.f32 %v149_v60, %v149_v60 }
  0xc4   :  { %v152_v62 = vmul.f32 -0.001358992, %v151_v61  ;;  %v159_v63 = vmul.f32 -0.00019511016, %v151_v61 }
  0xc6   :  { %v153_v2 = vadd.f32 0.041655596, %v152_v62  ;;  %v160_v3 = vadd.f32 0.008332121, %v159_v63 }
  0xc8   :  { %v154_v5 = vmul.f32 %v153_v2, %v151_v61  ;;  %v161_v6 = vmul.f32 %v160_v3, %v151_v61 }
  0xca   :  { %v155_v7 = vadd.f32 -0.4999988, %v154_v5  ;;  %v162_v8 = vadd.f32 -0.16666654, %v161_v6 }
  0xcc   :  { %v156_v11 = vmul.f32 %v155_v7, %v151_v61  ;;  %v163_v12 = vmul.f32 %v162_v8, %v151_v61 }
  0xce   :  { %v157_v14 = vadd.f32 1.0, %v156_v11  ;;  %v164_v13 = vadd.f32 1.0, %v163_v12 }
  0xd0   :  { %v165_v17 = vmul.f32 %v164_v13, %v149_v60  ;;  %v174_v18 = vxor.u32 2147483648, %v157_v14 }
  0xd2   :  { %v171_v19 = vxor.u32 2147483648, %v165_v17  ;;  %v331_v24 = vsel %vm329_vm0, %v174_v18, %v165_v17  ;;  %v175_v26 = vsel %vm173_vm3, %v174_v18, %v165_v17 }
  0xd4   :  { %v328_v23 = vsel %vm326_vm15, %v157_v14, %v171_v19  ;;  %v172_v25 = vsel %vm170_vm2, %v157_v14, %v171_v19 }
  0xd5   :  { %v332_v27 = vsel %vm325_vm14, %v328_v23, %v331_v24  ;;  %v176_v28 = vsel %vm169_vm1, %v172_v25, %v175_v26 }
  0xd6   :  { %v333_v29 = vsel %vm166_vm5, nan, %v332_v27  ;;  %v177_v30 = vsel %vm166_vm5, nan, %v176_v28 }
  0xd7   :  { %335 = vrot.lane.b32.xlu0 %v333_v29, %s407_s0  ;;  %179 = vst.msk [vmem:[#allocation2] sm:$0xff] %vm178_vm4, %v177_v30 }
 0x149   :  { %v336_v21 = vpop.permute.xlu0 %335 }
 0x14a   :  { %339 = vst.msk [vmem:[#allocation2] sm:$0xff] %vm338_vm6, %v336_v21 }
 0x14b   :  { %350 = dma.vmem_to_hbm [thread:$0]  %s346_s9, 128, %s348_s12, [#allocation3]  }
 0x14c   :  { %398 = dma.done.wait [#allocation3], 128  }
 0x14d   :  { %399 = vsyncadd [#allocation3], 4294967168 }
 0x14e   :  { %355 = vsyncpa [#allocation3], 1 }

</bundles_post_ra>
